<compile_context>
chip_gen: v6e
topology: v6e:2x2x1
jax: 0.10.0
libtpu: 0.0.40
codegen_flags: <defaults>
</compile_context>

<pallas_src>
import jax
import jax.numpy as jnp
from jax import lax
from jax.experimental import pallas as pl
from jax.experimental.pallas import tpu as pltpu

BN_EPS = 1e-5


def _round_up(x, m):
    return (x + m - 1) // m * m


# --------------------------------------------------------------------------
# Pallas kernel: in-kernel concat fusion (two accumulated dots, BN pre-folded)
#                -> ReLU -> Linear
# --------------------------------------------------------------------------
def _multimodal_head_kernel(
    xc_ref,     # [TB, Kc] f32   cloud_embedding row tile
    xt_ref,     # [TB, Kt] f32   tile_embedding  row tile
    w1c_ref,    # [Kc, Hp] bf16  BN-folded first Linear weight, cloud half
    w1t_ref,    # [Kt, Hp] bf16  BN-folded first Linear weight, tile half
    bias_ref,   # [2,  Hp] f32   row 0 = folded BN bias, row 1 = second Linear bias
    w2_ref,     # [Hp, Op] bf16  second Linear weight (padded)
    out_ref,    # [TB, Op] bf16
):
    # 'concat' fusion + first Linear (bias=False) with eval-mode BatchNorm scale
    # already folded into the weights.  Instead of materializing the concatenated
    # [TB, Kc+Kt] activation, do two accumulated MXU passes (one per modality)
    # into a single f32 accumulator -- equivalent to x @ [w1c; w1t].
    xc = xc_ref[...].astype(w1c_ref.dtype)   # bf16 cast inside the kernel (VPU)
    xt = xt_ref[...].astype(w1t_ref.dtype)
    h = jnp.dot(xc, w1c_ref[...], preferred_element_type=jnp.float32)
    h = h + jnp.dot(xt, w1t_ref[...], preferred_element_type=jnp.float32)

    # Folded-BN shift, then ReLU (f32 epilogue).  nn.Dropout() is identity in eval.
    # TODO(synk): training-mode dropout (stochastic mask) / batch-stat BN not implemented.
    h = jnp.maximum(h + bias_ref[0:1, :], 0.0)

    # Final Linear(temp_channels, output_dim) with bias.  bf16 MXU operands,
    # f32 accumulation; padded rows/cols of w2 are zero so the pad is exact.
    out = jnp.dot(h.astype(w2_ref.dtype), w2_ref[...],
                  preferred_element_type=jnp.float32)
    out_ref[...] = (out + bias_ref[1:2, :]).astype(out_ref.dtype)


# --------------------------------------------------------------------------
# Weight preparation (done once, outside the per-call path)
# --------------------------------------------------------------------------
def prepare_head_params(params, compute_dtype=jnp.bfloat16, out_dtype=jnp.bfloat16):
    """Fold BN into the first Linear, pad channel dims to 128, cast to bf16.

    The first Linear is kept split per modality so the kernel can consume the
    two embeddings directly (concat fusion happens via two accumulated dots).
    """
    # Fold eval-mode BatchNorm: y = (x@w1 - mean) * g/sqrt(v+eps) + beta
    #                             = x @ (w1 * s) + (beta - mean * s),  s = g/sqrt(v+eps)
    scale = params["bn_gamma"] * lax.rsqrt(params["bn_var"] + BN_EPS)      # [1, H]
    w1c = params["w1_cloud"] * scale                                       # [Kc, H]
    w1t = params["w1_tile"] * scale                                        # [Kt, H]
    bias1 = params["bn_beta"] - params["bn_mean"] * scale                  # [1, H]

    w2, b2 = params["w2"], params["b2"]
    Kc, H = w1c.shape
    Kt = w1t.shape[0]
    O = w2.shape[1]
    Hp = _round_up(H, 128)
    Op = _round_up(O, 128)
    # 'mlp' final block uses temp_channels == output_dim, so the padded widths
    # match and both bias vectors share one [2, Hp] operand.
    assert Hp == Op

    w1c_p = jnp.zeros((Kc, Hp), jnp.float32).at[:, :H].set(w1c)
    w1t_p = jnp.zeros((Kt, Hp), jnp.float32).at[:, :H].set(w1t)
    w2_p = jnp.zeros((Hp, Op), jnp.float32).at[:H, :O].set(w2)
    biases = jnp.zeros((2, Hp), jnp.float32)
    biases = biases.at[0, :H].set(bias1[0])
    biases = biases.at[1, :O].set(b2[0])

    return {
        "w1_cloud": w1c_p.astype(compute_dtype),
        "w1_tile": w1t_p.astype(compute_dtype),
        "w2": w2_p.astype(compute_dtype),
        "biases": biases,          # f32 epilogue operands
        "out_dim": O,
        "out_dtype": out_dtype,
    }


# --------------------------------------------------------------------------
# Forward wrapper
# --------------------------------------------------------------------------
def multimodal_forward(cloud_embedding, tile_embedding, head, *,
                       row_tile=512, slice_output=True):
    """'concat' fusion + final 'mlp' head as a single Pallas call.

    The two embeddings go in un-concatenated and un-cast (fusion/cast happen
    in-kernel).  The batch axis is tiled with large row tiles and marked
    "parallel" so v7x's two TensorCores both run at production batch sizes.
    """
    B = cloud_embedding.shape[0]
    Bp = _round_up(B, 8)
    if Bp != B:  # pad rows to a sublane multiple (no-op at the demo sizes)
        cloud_embedding = jnp.pad(cloud_embedding, ((0, Bp - B), (0, 0)))
        tile_embedding = jnp.pad(tile_embedding, ((0, Bp - B), (0, 0)))

    Kc = cloud_embedding.shape[1]
    Kt = tile_embedding.shape[1]
    Hp = head["w1_cloud"].shape[1]
    Op = head["w2"].shape[1]
    out_dtype = head["out_dtype"]

    TB = min(row_tile, Bp)
    grid = (pl.cdiv(Bp, TB),)

    # Row-tiled activations / output; resident (constant index_map) weights.
    in_specs = [
        pl.BlockSpec((TB, Kc), lambda i: (i, 0)),
        pl.BlockSpec((TB, Kt), lambda i: (i, 0)),
        pl.BlockSpec((Kc, Hp), lambda i: (0, 0)),
        pl.BlockSpec((Kt, Hp), lambda i: (0, 0)),
        pl.BlockSpec((2, Hp), lambda i: (0, 0)),
        pl.BlockSpec((Hp, Op), lambda i: (0, 0)),
    ]
    out_specs = pl.BlockSpec((TB, Op), lambda i: (i, 0))

    itemsize = lambda a: a.size * a.dtype.itemsize
    cost = pl.CostEstimate(
        flops=2 * Bp * (Kc + Kt) * Hp + 2 * Bp * Hp * Op,
        transcendentals=0,
        bytes_accessed=(itemsize(cloud_embedding) + itemsize(tile_embedding)
                        + itemsize(head["w1_cloud"]) + itemsize(head["w1_tile"])
                        + itemsize(head["w2"]) + itemsize(head["biases"])
                        + Bp * Op * jnp.dtype(out_dtype).itemsize),
    )

    out = pl.pallas_call(
        _multimodal_head_kernel,
        out_shape=jax.ShapeDtypeStruct((Bp, Op), out_dtype),
        grid=grid,
        in_specs=in_specs,
        out_specs=out_specs,
        compiler_params=pltpu.CompilerParams(
            dimension_semantics=("parallel",)),
        cost_estimate=cost,
    )(cloud_embedding, tile_embedding,
      head["w1_cloud"], head["w1_tile"], head["biases"], head["w2"])

    if slice_output:
        # Demo/validation glue; production consumers can take the lane-dense
        # padded [Bp, 128] slab directly (slice_output=False) and fuse the
        # slice into the next op.
        return out[:B, :head["out_dim"]]
    return out


def multimodal_forward_ref(cloud_embedding, tile_embedding, params):
    """Pure-JAX f32 reference mirroring the PyTorch forward (eval mode)."""
    x = jnp.concatenate([cloud_embedding, tile_embedding], axis=1)
    w1 = jnp.concatenate([params["w1_cloud"], params["w1_tile"]], axis=0)
    h = x @ w1
    h = (h - params["bn_mean"]) * lax.rsqrt(params["bn_var"] + BN_EPS)
    h = h * params["bn_gamma"] + params["bn_beta"]
    h = jnp.maximum(h, 0.0)
    return h @ params["w2"] + params["b2"]


# --------------------------------------------------------------------------
# Simulated (injected) feature extractors — plain-JAX glue
# --------------------------------------------------------------------------
def simulate_feature_extractors(batch, fe_params):
    """Deterministic stand-ins for the injected cloud_fe / tile_fe modules.

    cloud: [B, 3, N]      -> mean over points -> linear -> [B, Cc]
    tile : [B, C, Ht, Wt] -> mean over H,W    -> linear -> [B, Ct]   (NCHW input)
    """
    cloud_pooled = jnp.mean(batch["cloud"], axis=2)           # [B, 3]
    tile_pooled = jnp.mean(batch["tile"], axis=(2, 3))        # [B, C]
    cloud_embedding = cloud_pooled @ fe_params["cloud_proj"]  # [B, Cc]
    tile_embedding = tile_pooled @ fe_params["tile_proj"]     # [B, Ct]
    return cloud_embedding, tile_embedding


def init_params(key, cloud_fe_size, tile_fe_size, output_dim, raw_tile_channels):
    ks = jax.random.split(key, 8)
    temp_channels = output_dim  # 'mlp' final block uses temp_channels = output_dim

    def glorot(k, shape):
        fan_in, fan_out = shape
        lim = (6.0 / (fan_in + fan_out)) ** 0.5
        return jax.random.uniform(k, shape, jnp.float32, -lim, lim)

    params = {
        "w1_cloud": glorot(ks[0], (cloud_fe_size, temp_channels)),
        "w1_tile": glorot(ks[1], (tile_fe_size, temp_channels)),
        "bn_mean": jax.random.normal(ks[2], (1, temp_channels), jnp.float32) * 0.1,
        "bn_var": jnp.abs(jax.random.normal(ks[3], (1, temp_channels), jnp.float32)) + 0.5,
        "bn_gamma": jnp.ones((1, temp_channels), jnp.float32),
        "bn_beta": jnp.zeros((1, temp_channels), jnp.float32),
        "w2": glorot(ks[4], (temp_channels, output_dim)),
        "b2": jax.random.normal(ks[5], (1, output_dim), jnp.float32) * 0.01,
    }
    fe_params = {
        "cloud_proj": glorot(ks[6], (3, cloud_fe_size)),
        "tile_proj": glorot(ks[7], (raw_tile_channels, tile_fe_size)),
    }
    return params, fe_params


if __name__ == "__main__":
    # Small, (8,128)-friendly shapes.
    B = 8
    cloud_fe_size = 128
    tile_fe_size = 128
    output_dim = 64
    n_points = 256
    tile_c, tile_h, tile_w = 4, 16, 16

    key = jax.random.PRNGKey(0)
    k_cloud, k_tile, k_par = jax.random.split(key, 3)

    batch = {
        "cloud": jax.random.normal(k_cloud, (B, 3, n_points), jnp.float32),
        "tile": jax.random.normal(k_tile, (B, tile_c, tile_h, tile_w), jnp.float32),
    }
    params, fe_params = init_params(k_par, cloud_fe_size, tile_fe_size,
                                    output_dim, tile_c)

    # One-time weight preparation: BN fold + lane padding + bf16 cast.
    head = prepare_head_params(params)

    cloud_emb, tile_emb = simulate_feature_extractors(batch, fe_params)

    out = multimodal_forward(cloud_emb, tile_emb, head)
    out = jax.block_until_ready(out)

    ref = multimodal_forward_ref(cloud_emb, tile_emb, params)
    assert out.shape == (B, output_dim)

    # bf16 MXU operands + bf16 output with f32 accumulation: scale-aware tolerance.
    err = jnp.max(jnp.abs(out.astype(jnp.float32) - ref))
    tol = 2e-2 * jnp.max(jnp.abs(ref)) + 1e-3
    assert err <= tol, f"mismatch vs JAX reference: err={err} tol={tol}"

    print("KERNEL_OK")
</pallas_src>

<mosaic_0001>
module attributes {stable_mosaic.version = 11 : i64} {
  func.func @_multimodal_head_kernel(%arg0: i32, %arg1: memref<8x128xf32, #tpu.memory_space<vmem>>, %arg2: memref<8x128xf32, #tpu.memory_space<vmem>>, %arg3: memref<128x128xbf16, #tpu.memory_space<vmem>>, %arg4: memref<128x128xbf16, #tpu.memory_space<vmem>>, %arg5: memref<2x128xf32, #tpu.memory_space<vmem>>, %arg6: memref<128x128xbf16, #tpu.memory_space<vmem>>, %arg7: memref<8x128xbf16, #tpu.memory_space<vmem>>) attributes {dimension_semantics = [#tpu.dimension_semantics<parallel>], iteration_bounds = array<i64: 1>, scalar_prefetch = 0 : i64, scratch_operands = 0 : i64, tpu.core_type = #tpu.core_type<tc>, window_params = [{transform_indices = @transform_0, window_bounds = array<i64: 8, 128>}, {transform_indices = @transform_1, window_bounds = array<i64: 8, 128>}, {pipeline_mode = #tpu.pipeline_mode<synchronous>, transform_indices = @transform_2, window_bounds = array<i64: 128, 128>}, {pipeline_mode = #tpu.pipeline_mode<synchronous>, transform_indices = @transform_3, window_bounds = array<i64: 128, 128>}, {pipeline_mode = #tpu.pipeline_mode<synchronous>, transform_indices = @transform_4, window_bounds = array<i64: 2, 128>}, {pipeline_mode = #tpu.pipeline_mode<synchronous>, transform_indices = @transform_5, window_bounds = array<i64: 128, 128>}, {transform_indices = @transform_6, window_bounds = array<i64: 8, 128>}]} {
    %c0 = arith.constant 0 : index
    %c0_0 = arith.constant 0 : index
    %0 = vector.load %arg1[%c0, %c0_0] : memref<8x128xf32, #tpu.memory_space<vmem>>, vector<8x128xf32>
    %1 = arith.truncf %0 : vector<8x128xf32> to vector<8x128xbf16>
    %c0_1 = arith.constant 0 : index
    %c0_2 = arith.constant 0 : index
    %2 = vector.load %arg2[%c0_1, %c0_2] : memref<8x128xf32, #tpu.memory_space<vmem>>, vector<8x128xf32>
    %3 = arith.truncf %2 : vector<8x128xf32> to vector<8x128xbf16>
    %c0_3 = arith.constant 0 : index
    %c0_4 = arith.constant 0 : index
    %4 = vector.load %arg3[%c0_3, %c0_4] : memref<128x128xbf16, #tpu.memory_space<vmem>>, vector<128x128xbf16>
    %cst = arith.constant dense<0.000000e+00> : vector<8x128xf32>
    %5 = tpu.matmul %1, %4, %cst {dimension_numbers = #tpu.dot_dimension_numbers<[1], [0], [0], [1], [0, 0, 1, 1], [], []>} : vector<8x128xbf16>, vector<128x128xbf16>, vector<8x128xf32> -> vector<8x128xf32>
    %c0_5 = arith.constant 0 : index
    %c0_6 = arith.constant 0 : index
    %6 = vector.load %arg4[%c0_5, %c0_6] : memref<128x128xbf16, #tpu.memory_space<vmem>>, vector<128x128xbf16>
    %cst_7 = arith.constant dense<0.000000e+00> : vector<8x128xf32>
    %7 = tpu.matmul %3, %6, %cst_7 {dimension_numbers = #tpu.dot_dimension_numbers<[1], [0], [0], [1], [0, 0, 1, 1], [], []>} : vector<8x128xbf16>, vector<128x128xbf16>, vector<8x128xf32> -> vector<8x128xf32>
    %8 = arith.addf %5, %7 : vector<8x128xf32>
    %c0_8 = arith.constant 0 : index
    %c0_9 = arith.constant 0 : index
    %9 = vector.load %arg5[%c0_8, %c0_9] : memref<2x128xf32, #tpu.memory_space<vmem>>, vector<1x128xf32>
    %10 = vector.broadcast %9 : vector<1x128xf32> to vector<8x128xf32>
    %11 = arith.addf %8, %10 : vector<8x128xf32>
    %cst_10 = arith.constant 0.000000e+00 : f32
    %12 = vector.broadcast %cst_10 : f32 to vector<8x128xf32>
    %13 = arith.maximumf %11, %12 : vector<8x128xf32>
    %14 = arith.truncf %13 : vector<8x128xf32> to vector<8x128xbf16>
    %c0_11 = arith.constant 0 : index
    %c0_12 = arith.constant 0 : index
    %15 = vector.load %arg6[%c0_11, %c0_12] : memref<128x128xbf16, #tpu.memory_space<vmem>>, vector<128x128xbf16>
    %cst_13 = arith.constant dense<0.000000e+00> : vector<8x128xf32>
    %16 = tpu.matmul %14, %15, %cst_13 {dimension_numbers = #tpu.dot_dimension_numbers<[1], [0], [0], [1], [0, 0, 1, 1], [], []>} : vector<8x128xbf16>, vector<128x128xbf16>, vector<8x128xf32> -> vector<8x128xf32>
    %c1 = arith.constant 1 : index
    %c0_14 = arith.constant 0 : index
    %17 = vector.load %arg5[%c1, %c0_14] : memref<2x128xf32, #tpu.memory_space<vmem>>, vector<1x128xf32>
    %18 = vector.broadcast %17 : vector<1x128xf32> to vector<8x128xf32>
    %19 = arith.addf %16, %18 : vector<8x128xf32>
    %20 = arith.truncf %19 : vector<8x128xf32> to vector<8x128xbf16>
    %c0_15 = arith.constant 0 : index
    %c0_16 = arith.constant 0 : index
    %21 = vector.load %arg7[%c0_15, %c0_16] : memref<8x128xbf16, #tpu.memory_space<vmem>>, vector<8x128xbf16>
    tpu.vector_store %arg7[%c0_15, %c0_16], %20 {strides = array<i32>} : memref<8x128xbf16, #tpu.memory_space<vmem>>, vector<8x128xbf16>,
    return
  }
  func.func @transform_0(%arg0: i32) -> (i32, i32) {
    %c0_i32 = arith.constant 0 : i32
    %c0_i32_0 = arith.constant 0 : i32
    return %arg0, %c0_i32 : i32, i32
  }
  func.func @transform_1(%arg0: i32) -> (i32, i32) {
    %c0_i32 = arith.constant 0 : i32
    %c0_i32_0 = arith.constant 0 : i32
    return %arg0, %c0_i32 : i32, i32
  }
  func.func @transform_2(%arg0: i32) -> (i32, i32) {
    %c0_i32 = arith.constant 0 : i32
    %c0_i32_0 = arith.constant 0 : i32
    %c0_i32_1 = arith.constant 0 : i32
    return %c0_i32, %c0_i32_0 : i32, i32
  }
  func.func @transform_3(%arg0: i32) -> (i32, i32) {
    %c0_i32 = arith.constant 0 : i32
    %c0_i32_0 = arith.constant 0 : i32
    %c0_i32_1 = arith.constant 0 : i32
    return %c0_i32, %c0_i32_0 : i32, i32
  }
  func.func @transform_4(%arg0: i32) -> (i32, i32) {
    %c0_i32 = arith.constant 0 : i32
    %c0_i32_0 = arith.constant 0 : i32
    %c0_i32_1 = arith.constant 0 : i32
    return %c0_i32, %c0_i32_0 : i32, i32
  }
  func.func @transform_5(%arg0: i32) -> (i32, i32) {
    %c0_i32 = arith.constant 0 : i32
    %c0_i32_0 = arith.constant 0 : i32
    %c0_i32_1 = arith.constant 0 : i32
    return %c0_i32, %c0_i32_0 : i32, i32
  }
  func.func @transform_6(%arg0: i32) -> (i32, i32) {
    %c0_i32 = arith.constant 0 : i32
    %c0_i32_0 = arith.constant 0 : i32
    return %arg0, %c0_i32 : i32, i32
  }
}

</mosaic_0001>

<bundles_post_ra>
// kernel: tpu_custom_call.1
= control target key start
LH: loop header
LB: loop body
LE: loop exit
PB: predicated region body
PF: predicated region fallthrough
CT: control target
= control target key end

     0   :  { %11 = vsyncpa [#allocation3], 0  ;;  %s820_s0 = inlined_call_operand.hbm [shape: f32[8,128], index: 0, kind: input, shape index: {}]   ;;  %s821_s1 = inlined_call_operand.hbm [shape: f32[8,128], index: 1, kind: input, shape index: {}]   ;;  %s822_s2 = inlined_call_operand.hbm [shape: bf16[128,128], index: 2, kind: input, shape index: {}]   ;;  %s823_s3 = inlined_call_operand.hbm [shape: bf16[128,128], index: 3, kind: input, shape index: {}]   ;;  %s824_s4 = inlined_call_operand.vmem [shape: f32[2,128], index: 4, kind: input, shape index: {}]   ;;  %s825_s5 = inlined_call_operand.hbm [shape: bf16[128,128], index: 5, kind: input, shape index: {}]   ;;  %s826_s6 = inlined_call_operand.hbm [shape: bf16[8,128], index: 6, kind: output, shape index: {}]  }
   0x1   :  { %12 = vsyncpa [#allocation6], 0 }
   0x2   :  { %13 = vsyncpa [#allocation9], 0 }
   0x3   :  { %14 = vsyncpa [#allocation4], 0  ;;  %s712_s21 = smov [#allocation5]  }
   0x4   :  { %s31_s22 = sshll.u32 %s712_s21, 4  ;;  %s32_s22 = int_to_ptr.vmem [resolvable:$true] %s31_s22 }
   0x5   :  { %s592_s23 = scalar_lea.vmem %s32_s22, 128  ;;  %p597_p1 = scmp.lt.s32.totalorder %s32_s22, %s32_s22 }
   0x6   :  { %p593_p0 = scmp.ne.s32.totalorder %s32_s22, %s592_s23  ;;  %p598_p2 = scmp.lt.s32.totalorder %s592_s23, %s592_s23 }
   0x8   :  { %p599_p3 = por %p598_p2, %p597_p1 }
   0xa   :  { %p600_p4 = pnand %p599_p3, %p593_p0 }
   0xc   :  { %603 = shalt.err (!%p600_p4)
}
   0xd   :  { %34 = dma.hbm_to_vmem [thread:$0]  %s821_s1, 128, %s32_s22, [#allocation6]  }
   0xe   :  { %s713_s26 = smov [#allocation8]   ;;  %s714_s28 = smov [#allocation2]  }
   0xf   :  { %s52_s27 = sshll.u32 %s713_s26, 4  ;;  %s21_s29 = sshll.u32 %s714_s28, 4  ;;  %s53_s27 = int_to_ptr.vmem [resolvable:$true] %s52_s27  ;;  %s22_s29 = int_to_ptr.vmem [resolvable:$true] %s21_s29 }
  0x10   :  { %s612_s30 = scalar_lea.vmem %s53_s27, 1024  ;;  %p617_p6 = scmp.lt.s32.totalorder %s53_s27, %s53_s27 }
  0x11   :  { %p613_p5 = scmp.ne.s32.totalorder %s53_s27, %s612_s30  ;;  %p618_p7 = scmp.lt.s32.totalorder %s612_s30, %s612_s30 }
  0x13   :  { %p619_p8 = por %p618_p7, %p617_p6 }
  0x15   :  { %p620_p9 = pnand %p619_p8, %p613_p5 }
  0x17   :  { %623 = shalt.err (!%p620_p9)
}
  0x18   :  { %s715_s7 = smov 64   ;;  %s716_s8 = smov 4  }
  0x19   :  { %58 = dma.hbm_to_vmem [thread:$0]  %s823_s3, 1024, %s53_s27, [#allocation9], %s715_s7, %s715_s7, %s716_s8  }
  0x1a   :  { %s632_s1 = scalar_lea.vmem %s22_s29, 128  ;;  %p637_p11 = scmp.lt.s32.totalorder %s22_s29, %s22_s29 }
  0x1b   :  { %p633_p10 = scmp.ne.s32.totalorder %s22_s29, %s632_s1  ;;  %p638_p12 = scmp.lt.s32.totalorder %s632_s1, %s632_s1 }
  0x1d   :  { %p639_p13 = por %p638_p12, %p637_p11 }
  0x1f   :  { %p640_p0 = pnand %p639_p13, %p633_p10 }
  0x21   :  { %643 = shalt.err (!%p640_p0)
}
  0x22   :  { %24 = dma.hbm_to_vmem [thread:$0]  %s820_s0, 128, %s22_s29, [#allocation3]  }
  0x23   :  { %s717_s13 = smov [#allocation7]   ;;  %s718_s15 = smov [#allocation10]  }
  0x24   :  { %s40_s14 = sshll.u32 %s717_s13, 4  ;;  %s66_s16 = sshll.u32 %s718_s15, 4  ;;  %s41_s14 = int_to_ptr.vmem [resolvable:$true] %s40_s14  ;;  %s67_s16 = int_to_ptr.vmem [resolvable:$true] %s66_s16 }
  0x25   :  { %s652_s17 = scalar_lea.vmem %s41_s14, 1024  ;;  %p657_p2 = scmp.lt.s32.totalorder %s41_s14, %s41_s14 }
  0x26   :  { %p653_p1 = scmp.ne.s32.totalorder %s41_s14, %s652_s17  ;;  %p658_p3 = scmp.lt.s32.totalorder %s652_s17, %s652_s17 }
  0x28   :  { %p659_p4 = por %p658_p3, %p657_p2 }
  0x2a   :  { %p660_p5 = pnand %p659_p4, %p653_p1 }
  0x2c   :  { %663 = shalt.err (!%p660_p5)
}
  0x2d   :  { %46 = dma.hbm_to_vmem [thread:$0]  %s822_s2, 1024, %s41_s14, [#allocation6], %s715_s7, %s715_s7, %s716_s8  }
  0x2e   :  { %s672_s0 = scalar_lea.vmem %s67_s16, 1024  ;;  %p677_p7 = scmp.lt.s32.totalorder %s67_s16, %s67_s16 }
  0x2f   :  { %p673_p6 = scmp.ne.s32.totalorder %s67_s16, %s672_s0  ;;  %p678_p8 = scmp.lt.s32.totalorder %s672_s0, %s672_s0 }
  0x31   :  { %p679_p9 = por %p678_p8, %p677_p7 }
  0x33   :  { %p680_p10 = pnand %p679_p9, %p673_p6 }
  0x35   :  { %683 = shalt.err (!%p680_p10)
}
  0x36   :  { %72 = dma.hbm_to_vmem [thread:$0]  %s825_s5, 1024, %s67_s16, [#allocation9], %s715_s7, %s715_s7, %s716_s8  }
  0x37   :  { %704 = dma.done.wait [#allocation3], 128  }
  0x38   :  { %705 = vsyncadd [#allocation3], 4294967168 }
  0x39   :  { %706 = dma.done.wait [#allocation6], 1152  }
  0x3a   :  { %707 = vsyncadd [#allocation6], 4294966144 }
  0x3b   :  { %708 = dma.done.wait [#allocation9], 2048  }
  0x3c   :  { %709 = vsyncadd [#allocation9], 4294965248  ;;  %v719_v0 = vmov 0.0   ;;  %vm720_vm0 = vmmov 0   ;;  %v560_v1 = vld [vmem:[#allocation8 + $0x38] sm:$0xff]   ;;  %v562_v3 = vld [vmem:[#allocation8 + $0x30] sm:$0xff]  }
  0x3d   :  { %490 = vmatprep.subr.bf16.mxu0 %v719_v0  ;;  %510 = vmatprep.subr.bf16.mxu1 %v719_v0  ;;  %v561_v2 = vld [vmem:[#allocation7 + $0x38] sm:$0xff]   ;;  %v563_v4 = vld [vmem:[#allocation7 + $0x30] sm:$0xff]   ;;  %v564_v5 = vld [vmem:[#allocation8 + $0x28] sm:$0xff]   ;;  %s721_s23 = smov [#allocation11]  }
  0x3e   :  { %506 = vmatprep.mubr.msk.bf16.mxu0 %vm720_vm0, %v719_v0  ;;  %526 = vmatprep.mubr.msk.bf16.mxu1 %vm720_vm0, %v719_v0  ;;  %v565_v6 = vld [vmem:[#allocation7 + $0x28] sm:$0xff]   ;;  %v566_v7 = vld [vmem:[#allocation8 + $0x20] sm:$0xff]   ;;  %v568_v9 = vld [vmem:[#allocation8 + $0x18] sm:$0xff]   ;;  %s426_s24 = sshll.u32 %s721_s23, 4  ;;  %s427_s24 = int_to_ptr.vmem [resolvable:$true] %s426_s24 }
  0x3f   :  { %491 = vmatpush3.bf16.msra.mxu0 %v560_v1  ;;  %511 = vmatpush3.bf16.msra.mxu1 %v561_v2  ;;  %v567_v8 = vld [vmem:[#allocation7 + $0x20] sm:$0xff]   ;;  %v569_v10 = vld [vmem:[#allocation7 + $0x18] sm:$0xff]   ;;  %v570_v11 = vld [vmem:[#allocation8 + $0x10] sm:$0xff]   ;;  %s684_s25 = scalar_lea.vmem %s427_s24, 64  ;;  %p689_p12 = scmp.lt.s32.totalorder %s427_s24, %s427_s24 }
  0x40   :  { %492 = vmatprep.subr.bf16.mxu0 %v719_v0  ;;  %512 = vmatprep.subr.bf16.mxu1 %v719_v0  ;;  %v571_v12 = vld [vmem:[#allocation7 + $0x10] sm:$0xff]   ;;  %v572_v13 = vld [vmem:[#allocation8 + $0x8] sm:$0xff]   ;;  %v574_v15 = vld [vmem:[#allocation8] sm:$0xff]   ;;  %p685_p11 = scmp.ne.s32.totalorder %s427_s24, %s684_s25  ;;  %p690_p13 = scmp.lt.s32.totalorder %s684_s25, %s684_s25 }
  0x41   :  { %v573_v14 = vld [vmem:[#allocation7 + $0x8] sm:$0xff]   ;;  %v91_v16 = vld [vmem:[#allocation5] sm:$0xff]  ;;  %v575_v17 = vld [vmem:[#allocation7] sm:$0xff]  }
  0x42   :  { %v89_v18 = vld [vmem:[#allocation2] sm:$0xff]  ;;  %v92_v19 = vpack.c.bf16 %v91_v16, %v91_v16  ;;  %v576_v21 = vld [vmem:[#allocation10 + $0x38] sm:$0xff]   ;;  %v578_v23 = vld [vmem:[#allocation10 + $0x28] sm:$0xff]   ;;  %p691_p0 = por %p690_p13, %p689_p12 }
  0x43   :  { %493 = vmatpush3.bf16.msra.mxu0 %v562_v3  ;;  %513 = vmatpush3.bf16.msra.mxu1 %v563_v4  ;;  %v90_v20 = vpack.c.bf16 %v89_v18, %v89_v18  ;;  %v577_v22 = vld [vmem:[#allocation10 + $0x30] sm:$0xff]   ;;  %v579_v24 = vld [vmem:[#allocation10 + $0x20] sm:$0xff]   ;;  %v580_v25 = vld [vmem:[#allocation10 + $0x18] sm:$0xff]  }
  0x44   :  { %494 = vmatprep.subr.bf16.mxu0 %v719_v0  ;;  %514 = vmatprep.subr.bf16.mxu1 %v719_v0  ;;  %v581_v26 = vld [vmem:[#allocation10 + $0x10] sm:$0xff]   ;;  %v582_v27 = vld [vmem:[#allocation10 + $0x8] sm:$0xff]   ;;  %v583_v28 = vld [vmem:[#allocation10] sm:$0xff]   ;;  %p692_p1 = pnand %p691_p0, %p685_p11 }
  0x45   :  { %v453_v31 = vld [vmem:[%s824_s4] ss:$0 sm:$0xff]  ;;  %v454_v42 = vld [vmem:[%s824_s4 + $0x1] ss:$0 sm:$0xff] }
  0x47   :  { %495 = vmatpush3.bf16.msra.mxu0 %v564_v5  ;;  %515 = vmatpush3.bf16.msra.mxu1 %v565_v6 }
  0x48   :  { %496 = vmatprep.subr.bf16.mxu0 %v719_v0  ;;  %516 = vmatprep.subr.bf16.mxu1 %v719_v0 }
  0x4b   :  { %497 = vmatpush3.bf16.msra.mxu0 %v566_v7  ;;  %517 = vmatpush3.bf16.msra.mxu1 %v567_v8 }
  0x4c   :  { %498 = vmatprep.subr.bf16.mxu0 %v719_v0  ;;  %518 = vmatprep.subr.bf16.mxu1 %v719_v0 }
  0x4f   :  { %499 = vmatpush3.bf16.msra.mxu0 %v568_v9  ;;  %519 = vmatpush3.bf16.msra.mxu1 %v569_v10 }
  0x50   :  { %500 = vmatprep.subr.bf16.mxu0 %v719_v0  ;;  %520 = vmatprep.subr.bf16.mxu1 %v719_v0 }
  0x53   :  { %501 = vmatpush3.bf16.msra.mxu0 %v570_v11  ;;  %521 = vmatpush3.bf16.msra.mxu1 %v571_v12 }
  0x54   :  { %502 = vmatprep.subr.bf16.mxu0 %v719_v0  ;;  %522 = vmatprep.subr.bf16.mxu1 %v719_v0 }
  0x57   :  { %503 = vmatpush3.bf16.msra.mxu0 %v572_v13  ;;  %523 = vmatpush3.bf16.msra.mxu1 %v573_v14 }
  0x58   :  { %504 = vmatprep.subr.bf16.mxu0 %v719_v0  ;;  %524 = vmatprep.subr.bf16.mxu1 %v719_v0 }
  0x5b   :  { %505 = vmatpush3.bf16.msra.mxu0 %v574_v15  ;;  %525 = vmatpush3.bf16.msra.mxu1 %v575_v17 }
  0x5c   :  { %530 = vmatprep.subr.bf16.mxu0 %v719_v0 }
  0x5e   :  { %507 = vmatmul.mubr.bf16.vlgmr.msra.gmra.mxu0 %v92_v19  ;;  %527 = vmatmul.mubr.bf16.vlgmr.msra.gmra.mxu1 %v90_v20 }
  0x5f   :  { %531 = vmatpush3.bf16.msra.mxu0 %v576_v21  ;;  %546 = vmatprep.mubr.msk.bf16.mxu0 %vm720_vm0, %v719_v0 }
  0x60   :  { %532 = vmatprep.subr.bf16.mxu0 %v719_v0 }
  0x63   :  { %533 = vmatpush3.bf16.msra.mxu0 %v577_v22 }
  0x64   :  { %534 = vmatprep.subr.bf16.mxu0 %v719_v0 }
  0x67   :  { %535 = vmatpush3.bf16.msra.mxu0 %v578_v23 }
  0x68   :  { %536 = vmatprep.subr.bf16.mxu0 %v719_v0 }
  0x6b   :  { %537 = vmatpush3.bf16.msra.mxu0 %v579_v24 }
  0x6c   :  { %538 = vmatprep.subr.bf16.mxu0 %v719_v0 }
  0x6f   :  { %539 = vmatpush3.bf16.msra.mxu0 %v580_v25 }
  0x70   :  { %540 = vmatprep.subr.bf16.mxu0 %v719_v0 }
  0x73   :  { %541 = vmatpush3.bf16.msra.mxu0 %v581_v26 }
  0x74   :  { %542 = vmatprep.subr.bf16.mxu0 %v719_v0 }
  0x77   :  { %543 = vmatpush3.bf16.msra.mxu0 %v582_v27 }
  0x78   :  { %544 = vmatprep.subr.bf16.mxu0 %v719_v0 }
  0x7b   :  { %545 = vmatpush3.bf16.msra.mxu0 %v583_v28 }
 0x11e   :  { %v207_v29 = vpop.f32.mrf.mxu0  ;;  %v295_v30 = vpop.f32.mrf.mxu1 }
 0x11f   :  { %v296_v32 = vadd.f32 %v295_v30, %v207_v29 }
 0x120   :  { %v508_v33 = vpop.f32.mrf.mxu0  ;;  %v528_v34 = vpop.f32.mrf.mxu1 }
 0x121   :  { %v306_v35 = vadd.f32 %v453_v31, %v296_v32 }
 0x122   :  { %v210_v36 = vpop.f32.mrf.mxu0  ;;  %v298_v37 = vpop.f32.mrf.mxu1 }
 0x123   :  { %v307_v38 = vmax.f32 %v306_v35, 0.0 }
 0x124   :  { %v509_v39 = vpop.f32.mrf.mxu0  ;;  %v529_v40 = vpop.f32.mrf.mxu1 }
 0x125   :  { %v308_v41 = vpack.c.bf16 %v307_v38, %v307_v38 }
 0x127   :  { %547 = vmatmul.mubr.bf16.vlgmr.msra.gmra.mxu0 %v308_v41 }
 0x1e7   :  { %v412_v43 = vpop.f32.mrf.mxu0 }
 0x1e8   :  { %v413_v44 = vadd.f32 %v454_v42, %v412_v43 }
 0x1e9   :  { %v548_v45 = vpop.f32.mrf.mxu0 }
 0x1ea   :  { %v418_v46 = vpack.c.bf16 %v413_v44, %v413_v44 }
 0x1eb   :  { %v415_v47 = vpop.f32.mrf.mxu0 }
 0x1ec   :  { %419 = vst [vmem:[#allocation11] sm:$0xf] %v418_v46 }
 0x1ed   :  { %v549_v48 = vpop.f32.mrf.mxu0 }
 0x1ee   :  { %695 = shalt.err (!%p692_p1)
}
 0x1ef   :  { %429 = dma.vmem_to_hbm [thread:$0]  %s427_s24, 64, %s826_s6, [#allocation4]  }
 0x1f0   :  { %710 = dma.done.wait [#allocation4], 64  }
 0x1f1   :  { %711 = vsyncadd [#allocation4], 4294967232 }
 0x1f2   :  { %433 = vsyncpa [#allocation3], 1 }
 0x1f3   :  { %434 = vsyncpa [#allocation6], 1 }
 0x1f4   :  { %435 = vsyncpa [#allocation9], 1 }
 0x1f5   :  { %436 = vsyncpa [#allocation4], 1 }

</bundles_post_ra>
